<compile_context>
chip_gen: v5e
topology: v5e:2x2
jax: 0.10.0
libtpu: 0.0.40
codegen_flags: <defaults>
</compile_context>

<pallas_src>
import math

import jax
import jax.numpy as jnp
from jax.experimental import pallas as pl
from jax.experimental.pallas import tpu as pltpu


# ----------------------------- Pallas kernels ------------------------------ #

def _proj_kernel(feat_ref, w1f_ref, b1f_ref, q_ref, k_ref, v_ref):
    """fc1 folded into the fused q|k|v projection: one MXU matmul, bf16 out."""
    feat = feat_ref[0]                                                    # (TN, d_points)
    D = q_ref.shape[2]
    qkv = jnp.dot(feat.astype(jnp.bfloat16), w1f_ref[...],
                  preferred_element_type=jnp.float32) + b1f_ref[...]      # (TN, 3*D) f32
    qkv = qkv.astype(jnp.bfloat16)
    q_ref[0] = qkv[:, 0 * D:1 * D]
    k_ref[0] = qkv[:, 1 * D:2 * D]
    v_ref[0] = qkv[:, 2 * D:3 * D]


def _attn_kernel(rel_ref, q_ref, knb_ref, vnb_ref, pre_ref,
                 wd1_ref, bd1_ref, wd2_ref, bd2_ref,
                 wg1_ref, bg1_ref, wg2_ref, bg2_ref,
                 w2_ref, b2_ref,
                 res_ref, attn_ref):
    TN, K, D = knb_ref.shape[1], knb_ref.shape[2], knb_ref.shape[3]

    # fc_delta first layer as 3 VPU FMAs (a contraction-dim-3 matmul would
    # waste the MXU and force a last-dim-3 layout).  rel = xyz - knn_xyz is
    # precomputed in the wrapper (cheap, B*N*K*3).
    rel = rel_ref[0]                                                      # (TN, K, 3) f32
    wd1 = wd1_ref[...]                                                    # (3, D) f32
    pos_h = (rel[:, :, 0:1] * wd1[0:1, :]
             + rel[:, :, 1:2] * wd1[1:2, :]
             + rel[:, :, 2:3] * wd1[2:3, :]
             + bd1_ref[...])                                              # (TN, K, D)
    pos_h = jnp.maximum(pos_h, 0.0)
    pos = jnp.dot(pos_h.reshape(TN * K, D).astype(jnp.bfloat16), wd2_ref[...],
                  preferred_element_type=jnp.float32) + bd2_ref[...]
    pos = pos.reshape(TN, K, D)                                           # (TN, K, D)

    q = q_ref[0].astype(jnp.float32)                                      # (TN, D)
    knb = knb_ref[0].astype(jnp.float32)                                  # (TN, K, D)
    g_in = (q[:, None, :] - knb + pos).reshape(TN * K, D)
    # Fold v + pos_enc now so `pos` (and vnb) need not stay live past here.
    vpos = vnb_ref[0].astype(jnp.float32) + pos                           # (TN, K, D)

    # fc_gamma(q - k + pos_enc); the 1/sqrt(d_model) softmax scale is folded
    # into wg2/bg2 on the host, so `logits` is already scaled.
    gh = jnp.dot(g_in.astype(jnp.bfloat16), wg1_ref[...],
                 preferred_element_type=jnp.float32) + bg1_ref[...]
    gh = jnp.maximum(gh, 0.0)
    logits = jnp.dot(gh.astype(jnp.bfloat16), wg2_ref[...],
                     preferred_element_type=jnp.float32) + bg2_ref[...]
    logits = logits.reshape(TN, K, D)

    # softmax over the neighbor axis (dim=-2); divide via EUP approx reciprocal.
    m = jnp.max(logits, axis=1, keepdims=True)
    e = jnp.exp(logits - m)
    s = jnp.sum(e, axis=1, keepdims=True)
    attn = e * pl.reciprocal(s, approx=True)                              # (TN, K, D)
    attn_ref[0] = attn.astype(jnp.bfloat16)                               # bf16, 4-D store

    # einsum('bmnf,bmnf->bmf', attn, v + pos_enc), then fc2 + residual.
    wsum = jnp.sum(attn * vpos, axis=1)                                   # (TN, D)
    out = jnp.dot(wsum.astype(jnp.bfloat16), w2_ref[...],
                  preferred_element_type=jnp.float32) + b2_ref[...]
    res_ref[0] = out + pre_ref[0]


# ------------------------------ helpers ------------------------------------ #

def _knn(xyz, k):
    # ||a-b||^2 = ||a||^2 + ||b||^2 - 2 a.b  — MXU-friendly, no (B,N,N,3) temp.
    # top_k of the negated distances replaces the full argsort (tie-breaking
    # may differ from torch.argsort for coincident points).
    sq = jnp.sum(xyz * xyz, axis=-1)
    dots = jnp.einsum("bnd,bmd->bnm", xyz, xyz)
    dists = sq[:, :, None] + sq[:, None, :] - 2.0 * dots
    _, idx = jax.lax.top_k(-dists, k)
    return idx


def _vmem_limit_bytes():
    try:
        kind = jax.devices()[0].device_kind.lower()
    except Exception:
        kind = ""
    if "v7" in kind:
        return 48 * 1024 * 1024          # v7x: 64 MiB physical VMEM per core
    if "v5" in kind or "v6" in kind:
        return 96 * 1024 * 1024          # v5e/v6e: 128 MiB physical VMEM
    return None                          # unknown part: keep compiler default


def _pick_point_tile(N, K, D, d_points, cap, vmem_limit):
    """Largest point-tile whose estimated live set fits the VMEM budget."""
    budget = int(0.7 * (vmem_limit if vmem_limit is not None else 32 * 1024 * 1024))

    def est(tn):
        temps = 8 * tn * K * D * 4                                  # live f32 (TN,K,D) temps
        io = 2 * (tn * K * 3 * 4            # rel (double-buffered)
                  + tn * D * 2              # q (bf16)
                  + 2 * tn * K * D * 2      # k_nb, v_nb (bf16)
                  + tn * d_points * 4       # pre
                  + tn * K * D * 2          # attn out (bf16)
                  + tn * d_points * 4)      # res out
        weights = (3 * D + 4 * D * D + D * d_points) * 4
        return temps + io + weights

    cands = [c for c in (512, 256, 128, 64, 32, 16, 8)
             if c <= min(cap, N) and N % c == 0]
    if not cands:
        return N
    for c in cands:
        if est(c) <= budget:
            return c
    return cands[-1]


# ------------------------------ Python wrapper ------------------------------ #

def transformer_block_forward(xyz, features, params, k, tn=None):
    B, N, _ = xyz.shape
    d_points = features.shape[-1]
    d_model = params["w1"].shape[1]
    K = k
    bf16 = jnp.bfloat16

    vmem_limit = _vmem_limit_bytes()
    tn = _pick_point_tile(N, K, d_model, d_points, tn if tn else 512, vmem_limit)
    grid = (B, N // tn)

    compiler_params = pltpu.CompilerParams(
        dimension_semantics=("parallel", "parallel"),
        vmem_limit_bytes=vmem_limit,
    )

    # Host-side weight prep: fold fc1 into the fused q|k|v projection, fold the
    # 1/sqrt(d_model) softmax scale into the last fc_gamma layer, cast MXU
    # weights to bf16.
    wqkv = jnp.concatenate([params["wq"], params["wk"], params["wv"]], axis=1)
    w1f = (params["w1"] @ wqkv).astype(bf16)                 # (d_points, 3*d_model)
    b1f = params["b1"] @ wqkv                                # (1, 3*d_model) f32
    scale = 1.0 / math.sqrt(d_model)
    wd2_b = params["wd2"].astype(bf16)
    wg1_b = params["wg1"].astype(bf16)
    wg2_b = (params["wg2"] * scale).astype(bf16)
    bg2_s = params["bg2"] * scale
    w2_b = params["w2"].astype(bf16)

    knn_idx = _knn(xyz, K)                                   # (B, N, K)

    # --- kernel 1: fc1-folded fused q/k/v projection (bf16 writeback) ---
    flops1 = int(2 * B * N * d_points * 3 * d_model)
    bytes1 = int(4 * B * N * d_points + 2 * B * N * 3 * d_model
                 + 2 * d_points * 3 * d_model + 4 * 3 * d_model)
    q, ks, vs = pl.pallas_call(
        _proj_kernel,
        grid=grid,
        in_specs=[
            pl.BlockSpec((1, tn, d_points), lambda b, n: (b, n, 0)),
            pl.BlockSpec((d_points, 3 * d_model), lambda b, n: (0, 0)),
            pl.BlockSpec((1, 3 * d_model), lambda b, n: (0, 0)),
        ],
        out_specs=[
            pl.BlockSpec((1, tn, d_model), lambda b, n: (b, n, 0)),
            pl.BlockSpec((1, tn, d_model), lambda b, n: (b, n, 0)),
            pl.BlockSpec((1, tn, d_model), lambda b, n: (b, n, 0)),
        ],
        out_shape=[
            jax.ShapeDtypeStruct((B, N, d_model), bf16),
            jax.ShapeDtypeStruct((B, N, d_model), bf16),
            jax.ShapeDtypeStruct((B, N, d_model), bf16),
        ],
        compiler_params=compiler_params,
        cost_estimate=pl.CostEstimate(flops=flops1, transcendentals=0,
                                      bytes_accessed=bytes1),
    )(features, w1f, b1f)

    # Neighbor gathers stay in XLA (data-dependent gather); gathered values are
    # bf16, halving the K-expanded HBM round trip vs f32.
    # TODO(synk): move the gather in-kernel (VMEM-resident per-batch k/v +
    # scalar-prefetched knn_idx, or manual row DMAs) to remove the K-expanded
    # HBM round trip entirely.
    gather = jax.vmap(lambda a, idx: a[idx])
    k_nb = gather(ks, knn_idx)                               # (B, N, K, D) bf16
    v_nb = gather(vs, knn_idx)                               # (B, N, K, D) bf16
    rel = xyz[:, :, None, :] - gather(xyz, knn_idx)          # (B, N, K, 3) f32

    # --- kernel 2: pos-enc MLP, gamma MLP, softmax, weighted sum, fc2 + res ---
    flops2 = int(2 * B * N * K * d_model * d_model * 3
                 + 2 * B * N * d_model * d_points
                 + 20 * B * N * K * d_model)
    transc2 = int(B * N * K * d_model + B * N * d_model)
    bytes2 = int(4 * B * N * K * 3 + 2 * B * N * d_model
                 + 2 * 2 * B * N * K * d_model + 4 * B * N * d_points
                 + 2 * B * N * K * d_model + 4 * B * N * d_points
                 + 2 * 3 * d_model * d_model + 2 * d_model * d_points
                 + 4 * 8 * d_model + 4 * d_points)

    res, attn = pl.pallas_call(
        _attn_kernel,
        grid=grid,
        in_specs=[
            pl.BlockSpec((1, tn, K, 3), lambda b, n: (b, n, 0, 0)),
            pl.BlockSpec((1, tn, d_model), lambda b, n: (b, n, 0)),
            pl.BlockSpec((1, tn, K, d_model), lambda b, n: (b, n, 0, 0)),
            pl.BlockSpec((1, tn, K, d_model), lambda b, n: (b, n, 0, 0)),
            pl.BlockSpec((1, tn, d_points), lambda b, n: (b, n, 0)),
            pl.BlockSpec((3, d_model), lambda b, n: (0, 0)),
            pl.BlockSpec((1, d_model), lambda b, n: (0, 0)),
            pl.BlockSpec((d_model, d_model), lambda b, n: (0, 0)),
            pl.BlockSpec((1, d_model), lambda b, n: (0, 0)),
            pl.BlockSpec((d_model, d_model), lambda b, n: (0, 0)),
            pl.BlockSpec((1, d_model), lambda b, n: (0, 0)),
            pl.BlockSpec((d_model, d_model), lambda b, n: (0, 0)),
            pl.BlockSpec((1, d_model), lambda b, n: (0, 0)),
            pl.BlockSpec((d_model, d_points), lambda b, n: (0, 0)),
            pl.BlockSpec((1, d_points), lambda b, n: (0, 0)),
        ],
        out_specs=[
            pl.BlockSpec((1, tn, d_points), lambda b, n: (b, n, 0)),
            pl.BlockSpec((1, tn, K, d_model), lambda b, n: (b, n, 0, 0)),
        ],
        out_shape=[
            jax.ShapeDtypeStruct((B, N, d_points), jnp.float32),
            jax.ShapeDtypeStruct((B, N, K, d_model), bf16),
        ],
        compiler_params=compiler_params,
        cost_estimate=pl.CostEstimate(flops=flops2, transcendentals=transc2,
                                      bytes_accessed=bytes2),
    )(rel, q, k_nb, v_nb, features,
      params["wd1"], params["bd1"], wd2_b, params["bd2"],
      wg1_b, params["bg1"], wg2_b, bg2_s,
      w2_b, params["b2"])

    return res, attn


# ------------------------------ Reference (JAX) ----------------------------- #

def reference_forward(xyz, features, p, k):
    knn_idx = _knn(xyz, k)   # same neighbor selection as the kernel wrapper
    gather = jax.vmap(lambda a, idx: a[idx])
    knn_xyz = gather(xyz, knn_idx)
    pre = features
    x = features @ p["w1"] + p["b1"][0]
    q = x @ p["wq"]
    k_nb = gather(x @ p["wk"], knn_idx)
    v_nb = gather(x @ p["wv"], knn_idx)
    rel = xyz[:, :, None, :] - knn_xyz
    pos = jnp.maximum(rel @ p["wd1"] + p["bd1"][0], 0.0) @ p["wd2"] + p["bd2"][0]
    g = q[:, :, None, :] - k_nb + pos
    a = jnp.maximum(g @ p["wg1"] + p["bg1"][0], 0.0) @ p["wg2"] + p["bg2"][0]
    a = jax.nn.softmax(a / jnp.sqrt(jnp.float32(a.shape[-1])), axis=-2)
    res = jnp.einsum("bmnf,bmnf->bmf", a, v_nb + pos)
    res = res @ p["w2"] + p["b2"][0] + pre
    return res, a


# ----------------------------------- main ----------------------------------- #

def _init_params(key, d_points, d_model):
    def lin(key, fan_in, fan_out):
        bound = 1.0 / math.sqrt(fan_in)
        kw, kb = jax.random.split(key)
        w = jax.random.uniform(kw, (fan_in, fan_out), jnp.float32, -bound, bound)
        b = jax.random.uniform(kb, (1, fan_out), jnp.float32, -bound, bound)
        return w, b

    keys = jax.random.split(key, 8)
    p = {}
    p["w1"], p["b1"] = lin(keys[0], d_points, d_model)     # fc1
    p["w2"], p["b2"] = lin(keys[1], d_model, d_points)     # fc2
    p["wd1"], p["bd1"] = lin(keys[2], 3, d_model)          # fc_delta[0]
    p["wd2"], p["bd2"] = lin(keys[3], d_model, d_model)    # fc_delta[2]
    p["wg1"], p["bg1"] = lin(keys[4], d_model, d_model)    # fc_gamma[0]
    p["wg2"], p["bg2"] = lin(keys[5], d_model, d_model)    # fc_gamma[2]
    bound = 1.0 / math.sqrt(d_model)
    p["wq"] = jax.random.uniform(keys[6], (d_model, d_model), jnp.float32, -bound, bound)
    kk, kv = jax.random.split(keys[7])
    p["wk"] = jax.random.uniform(kk, (d_model, d_model), jnp.float32, -bound, bound)
    p["wv"] = jax.random.uniform(kv, (d_model, d_model), jnp.float32, -bound, bound)
    return p


if __name__ == "__main__":
    B, N, d_points, d_model, K = 2, 16, 16, 32, 8

    key = jax.random.PRNGKey(0)
    k_xyz, k_feat, k_par = jax.random.split(key, 3)
    xyz = jax.random.normal(k_xyz, (B, N, 3), jnp.float32)
    features = jax.random.normal(k_feat, (B, N, d_points), jnp.float32)
    params = _init_params(k_par, d_points, d_model)

    # tn=8 cap exercises the (batch, point-tile) grid even at this toy N.
    res, attn = transformer_block_forward(xyz, features, params, K, tn=8)
    res = jax.block_until_ready(res)
    attn = jax.block_until_ready(attn)

    res_ref, attn_ref = reference_forward(xyz, features, params, K)
    assert res.shape == (B, N, d_points) and attn.shape == (B, N, K, d_model)
    # Tolerances loosened vs a pure-f32 kernel: bf16 MXU operands / bf16 q,k,v
    # transport / bf16 attn output + EUP approx reciprocal are an expected
    # precision change, not a bug.
    assert jnp.allclose(res, res_ref, atol=5e-2, rtol=5e-2), "res mismatch"
    assert jnp.allclose(attn.astype(jnp.float32), attn_ref, atol=2e-2, rtol=5e-2), "attn mismatch"

    print("KERNEL_OK")
</pallas_src>

<mosaic_0001>
module attributes {stable_mosaic.version = 11 : i64} {
  func.func @_proj_kernel(%arg0: i32, %arg1: i32, %arg2: memref<1x8x16xf32, #tpu.memory_space<vmem>>, %arg3: memref<16x96xbf16, #tpu.memory_space<vmem>>, %arg4: memref<1x96xf32, #tpu.memory_space<vmem>>, %arg5: memref<1x8x32xbf16, #tpu.memory_space<vmem>>, %arg6: memref<1x8x32xbf16, #tpu.memory_space<vmem>>, %arg7: memref<1x8x32xbf16, #tpu.memory_space<vmem>>) attributes {dimension_semantics = [#tpu.dimension_semantics<parallel>, #tpu.dimension_semantics<parallel>], iteration_bounds = array<i64: 2, 2>, scalar_prefetch = 0 : i64, scratch_operands = 0 : i64, tpu.core_type = #tpu.core_type<tc>, window_params = [{transform_indices = @transform_0, window_bounds = array<i64: 1, 8, 16>}, {pipeline_mode = #tpu.pipeline_mode<synchronous>, transform_indices = @transform_1, window_bounds = array<i64: 16, 96>}, {pipeline_mode = #tpu.pipeline_mode<synchronous>, transform_indices = @transform_2, window_bounds = array<i64: 1, 96>}, {transform_indices = @transform_3, window_bounds = array<i64: 1, 8, 32>}, {transform_indices = @transform_4, window_bounds = array<i64: 1, 8, 32>}, {transform_indices = @transform_5, window_bounds = array<i64: 1, 8, 32>}]} {
    %c0 = arith.constant 0 : index
    %c0_0 = arith.constant 0 : index
    %c0_1 = arith.constant 0 : index
    %0 = vector.load %arg2[%c0, %c0_0, %c0_1] : memref<1x8x16xf32, #tpu.memory_space<vmem>>, vector<1x8x16xf32>
    %1 = vector.shape_cast %0 : vector<1x8x16xf32> to vector<8x16xf32>
    %2 = arith.truncf %1 : vector<8x16xf32> to vector<8x16xbf16>
    %c0_2 = arith.constant 0 : index
    %c0_3 = arith.constant 0 : index
    %3 = vector.load %arg3[%c0_2, %c0_3] : memref<16x96xbf16, #tpu.memory_space<vmem>>, vector<16x96xbf16>
    %cst = arith.constant dense<0.000000e+00> : vector<8x96xf32>
    %4 = tpu.matmul %2, %3, %cst {dimension_numbers = #tpu.dot_dimension_numbers<[1], [0], [0], [1], [0, 0, 1, 1], [], []>} : vector<8x16xbf16>, vector<16x96xbf16>, vector<8x96xf32> -> vector<8x96xf32>
    %c0_4 = arith.constant 0 : index
    %c0_5 = arith.constant 0 : index
    %5 = vector.load %arg4[%c0_4, %c0_5] : memref<1x96xf32, #tpu.memory_space<vmem>>, vector<1x96xf32>
    %6 = vector.broadcast %5 : vector<1x96xf32> to vector<8x96xf32>
    %7 = arith.addf %4, %6 : vector<8x96xf32>
    %8 = arith.truncf %7 : vector<8x96xf32> to vector<8x96xbf16>
    %9 = vector.extract_strided_slice %8 {offsets = [0, 0], sizes = [8, 32], strides = [1, 1]} : vector<8x96xbf16> to vector<8x32xbf16>
    %c0_6 = arith.constant 0 : index
    %c0_7 = arith.constant 0 : index
    %c0_8 = arith.constant 0 : index
    %10 = vector.load %arg5[%c0_6, %c0_7, %c0_8] : memref<1x8x32xbf16, #tpu.memory_space<vmem>>, vector<1x8x32xbf16>
    %11 = vector.shape_cast %10 : vector<1x8x32xbf16> to vector<8x32xbf16>
    %12 = vector.shape_cast %9 : vector<8x32xbf16> to vector<1x8x32xbf16>
    tpu.vector_store %arg5[%c0_6, %c0_7, %c0_8], %12 {strides = array<i32>} : memref<1x8x32xbf16, #tpu.memory_space<vmem>>, vector<1x8x32xbf16>,
    %13 = vector.extract_strided_slice %8 {offsets = [0, 32], sizes = [8, 32], strides = [1, 1]} : vector<8x96xbf16> to vector<8x32xbf16>
    %c0_9 = arith.constant 0 : index
    %c0_10 = arith.constant 0 : index
    %c0_11 = arith.constant 0 : index
    %14 = vector.load %arg6[%c0_9, %c0_10, %c0_11] : memref<1x8x32xbf16, #tpu.memory_space<vmem>>, vector<1x8x32xbf16>
    %15 = vector.shape_cast %14 : vector<1x8x32xbf16> to vector<8x32xbf16>
    %16 = vector.shape_cast %13 : vector<8x32xbf16> to vector<1x8x32xbf16>
    tpu.vector_store %arg6[%c0_9, %c0_10, %c0_11], %16 {strides = array<i32>} : memref<1x8x32xbf16, #tpu.memory_space<vmem>>, vector<1x8x32xbf16>,
    %17 = vector.extract_strided_slice %8 {offsets = [0, 64], sizes = [8, 32], strides = [1, 1]} : vector<8x96xbf16> to vector<8x32xbf16>
    %c0_12 = arith.constant 0 : index
    %c0_13 = arith.constant 0 : index
    %c0_14 = arith.constant 0 : index
    %18 = vector.load %arg7[%c0_12, %c0_13, %c0_14] : memref<1x8x32xbf16, #tpu.memory_space<vmem>>, vector<1x8x32xbf16>
    %19 = vector.shape_cast %18 : vector<1x8x32xbf16> to vector<8x32xbf16>
    %20 = vector.shape_cast %17 : vector<8x32xbf16> to vector<1x8x32xbf16>
    tpu.vector_store %arg7[%c0_12, %c0_13, %c0_14], %20 {strides = array<i32>} : memref<1x8x32xbf16, #tpu.memory_space<vmem>>, vector<1x8x32xbf16>,
    return
  }
  func.func @transform_0(%arg0: i32, %arg1: i32) -> (i32, i32, i32) {
    %c0_i32 = arith.constant 0 : i32
    %c0_i32_0 = arith.constant 0 : i32
    return %arg0, %arg1, %c0_i32 : i32, i32, i32
  }
  func.func @transform_1(%arg0: i32, %arg1: i32) -> (i32, i32) {
    %c0_i32 = arith.constant 0 : i32
    %c0_i32_0 = arith.constant 0 : i32
    %c0_i32_1 = arith.constant 0 : i32
    return %c0_i32, %c0_i32_0 : i32, i32
  }
  func.func @transform_2(%arg0: i32, %arg1: i32) -> (i32, i32) {
    %c0_i32 = arith.constant 0 : i32
    %c0_i32_0 = arith.constant 0 : i32
    %c0_i32_1 = arith.constant 0 : i32
    return %c0_i32, %c0_i32_0 : i32, i32
  }
  func.func @transform_3(%arg0: i32, %arg1: i32) -> (i32, i32, i32) {
    %c0_i32 = arith.constant 0 : i32
    %c0_i32_0 = arith.constant 0 : i32
    return %arg0, %arg1, %c0_i32 : i32, i32, i32
  }
  func.func @transform_4(%arg0: i32, %arg1: i32) -> (i32, i32, i32) {
    %c0_i32 = arith.constant 0 : i32
    %c0_i32_0 = arith.constant 0 : i32
    return %arg0, %arg1, %c0_i32 : i32, i32, i32
  }
  func.func @transform_5(%arg0: i32, %arg1: i32) -> (i32, i32, i32) {
    %c0_i32 = arith.constant 0 : i32
    %c0_i32_0 = arith.constant 0 : i32
    return %arg0, %arg1, %c0_i32 : i32, i32, i32
  }
}

</mosaic_0001>

<bundles_post_ra>
// kernel: tpu_custom_call.1
= control target key start
LH: loop header
LB: loop body
LE: loop exit
PB: predicated region body
PF: predicated region fallthrough
CT: control target
= control target key end

     0   :  { %s1176_s0 = inlined_call_operand.hbm [shape: f32[2,16,16], index: 0, kind: input, shape index: {}]   ;;  %s1177_s1 = inlined_call_operand.hbm [shape: bf16[16,96], index: 1, kind: input, shape index: {}]   ;;  %s1178_s2 = inlined_call_operand.vmem [shape: f32[1,96], index: 2, kind: input, shape index: {}]   ;;  %s1179_s3 = inlined_call_operand.hbm [shape: bf16[2,16,32], index: 3, kind: output, shape index: {0}]   ;;  %s1180_s4 = inlined_call_operand.hbm [shape: bf16[2,16,32], index: 4, kind: output, shape index: {1}]   ;;  %s1181_s5 = inlined_call_operand.hbm [shape: bf16[2,16,32], index: 5, kind: output, shape index: {2}]  }
   0x1   :  { %1189 = sst [smem:[#allocation19_spill]] %s1177_s1 }
   0x2   :  { %1190 = sst [smem:[#allocation20_spill]] %s1180_s4 }
   0x3   :  { %1191 = sst [smem:[#allocation21_spill]] %s1181_s5 }
   0x4   :  { %11 = vsyncpa [#allocation3], 0 }
   0x5   :  { %13 = vsyncpa [#allocation3 + $0x1], 0 }
   0x6   :  { %14 = vsyncpa [#allocation6], 0 }
   0x7   :  { %15 = vsyncpa [#allocation4], 0 }
   0x8   :  { %17 = vsyncpa [#allocation4 + $0x1], 0 }
   0x9   :  { %18 = vsyncpa [#allocation9], 0 }
   0xa   :  { %20 = vsyncpa [#allocation9 + $0x1], 0  ;;  %s959_s18 = smov 0   ;;  %s961_s19 = smov 0  }
   0xb   :  { %s963_s20 = smov 0   ;;  %s965_s21 = smov 0  }
   0xc   :  { %s967_s22 = smov 0   ;;  %s969_s23 = smov 0  }
   0xd   :  { %s971_s24 = smov 0   ;;  %s973_s25 = smov 0  }
   0xe LB: > { %1192 = sst [smem:[#allocation15_spill]] %s894_s18  ;;  %s1000_s26 = sadd.s32 4294967295, %s922_s25   ;;  %s922_s25 = sphi %s973_s25, %s26_s25   ;;  %s918_s24 = sphi %s971_s24, %s1216_s24   ;;  %s914_s23 = sphi %s969_s23, %s1215_s23   ;;  %s910_s22 = sphi %s967_s22, %s1214_s22   ;;  %s906_s21 = sphi %s965_s21, %s1213_s21   ;;  %s902_s20 = sphi %s963_s20, %s1212_s20   ;;  %s898_s19 = sphi %s961_s19, %s1211_s19   ;;  %s894_s18 = sphi %s959_s18, %s1210_s18  }
   0xf   : > { %p567_p0 = scmp.ge.s32.totalorder %s922_s25, 1  ;;  %p61_p1 = scmp.eq.s32.totalorder %s1000_s26, 0 }
  0x10   : > { %p197_p2 = scmp.lt.s32.totalorder %s922_s25, 5  ;;  %s1193_s1 = sld [smem:[#allocation19_spill]] }
  0x11   : > { %s924_s6 = smov [#allocation5]   ;;  %s925_s8 = smov 64  }
  0x12   : > { %p1008_p3 = pnand %p567_p0, %p197_p2  ;;  %s210_s7 = sshll.u32 %s924_s6, 4  ;;  %s211_s7 = int_to_ptr.vmem [resolvable:$true] %s210_s7 }
  0x13   : > { %s926_s9 = smov 4   ;;  %s1182_s10 = sadd.s32 4294967294, %s922_s25  }
  0x14   : > { %p608_p4 = pneg %p1008_p3  ;;  %s35_s11 = sadd.s32 1, %s914_s23 }
  0x15   : > { %s38_s12 = sadd.s32 1, %s918_s24  ;;  %p36_p6 = scmp.ge.s32.totalorder %s35_s11, 2 }
  0x16   : > { %s208_s29 = sshll.u32 %s1193_s1, 4  ;;  %p609_p5 = pnand %p608_p4, %p61_p1  ;;  %s209_s29 = int_to_ptr.hbm [resolvable:$true] %s208_s29 }
  0x17   : > { %s47_s13 = sadd.s32 1, %s902_s20  ;;  %p54_p7 = scmp.ne.s32.totalorder %s902_s20, %s898_s19 }
  0x18   : > { %611 = dma.hbm_to_vmem [thread:$0]  (!%p609_p5), %s209_s29, 128, %s211_s7, [#allocation6], %s925_s8, %s925_s8, %s926_s9  }
  0x19   : > { %p55_p8 = scmp.eq.s32.totalorder %s922_s25, 0  ;;  %s1218_s11 = smov (%p36_p6, %s35_s11), 0 }
  0x1a   : > { %1195 = sst [smem:[#allocation16_spill]] %s1218_s11  ;;  %s1220_s12 = smov (!%p36_p6, %s38_s12), %s918_s24 }
  0x1b   : > { %s43_s14 = ssub.s32 %s914_s23, %s1218_s11  ;;  %p1028_p9 = por %p55_p8, %p54_p7 }
  0x1c   : > { %p40_p10 = scmp.ge.s32.totalorder %s1220_s12, 2  ;;  %p60_p11 = scmp.ne.s32.totalorder %s898_s19, %s894_s18 }
  0x1d   : > { %p128_p12 = scmp.eq.s32.totalorder %s1000_s26, 3  ;;  %p134_p13 = scmp.eq.s32.totalorder %s1182_s10, 3 }
  0x1e   : > { %s1222_s12 = smov (%p40_p10, %s1220_s12), 0  ;;  %p1041_p0 = por %p61_p1, %p60_p11 }
  0x1f   : > { %1197 = sst [smem:[#allocation17_spill]] %s1222_s12  ;;  %p1045_p2 = por %p128_p12, %p54_p7 }
  0x20   : > { %s42_s27 = ssub.s32 %s918_s24, %s1222_s12  ;;  %p1051_p4 = por %p134_p13, %p60_p11 }
  0x21   : > { %s44_s29 = sor.u32 %s43_s14, %s42_s27  ;;  %p627_p5 = scmp.lt.s32.totalorder %s922_s25, 4 }
  0x22   : > { %s1200_s28 = scalar_select %p1051_p4, 1, 0 }
  0x23   : > { %p45_p6 = scmp.eq.s32.totalorder %s44_s29, 0  ;;  %s227_s6 = sand.u32 1, %s902_s20  }
  0x24   : > { %1201 = sst [smem:[#allocation18_spill]] %s1200_s28  ;;  %s570_s7 = sshll.u32 %s227_s6, 3 }
  0x25   : > { %s1058_s8 = scalar_select %p45_p6, %s902_s20, %s47_s13  }
  0x26   : > { %s571_s9 = sshll.u32 %s918_s24, 1  ;;  %s231_s1 = scalar_lea.vmem [#allocation2], %s570_s7 }
  0x27   : > { %s235_s10 = sadd.s32 %s914_s23, %s571_s9  ;;  %s241_s11 = sshll.u32 %s231_s1, 4  ;;  %s242_s11 = int_to_ptr.vmem [resolvable:$true] %s241_s11 }
  0x28   : > { %s572_s18 = sshll.u32 %s235_s10, 3  ;;  %p613_p7 = pnand %p627_p5, %p1028_p9 }
  0x29   : > { %s237_s12 = scalar_lea.hbm %s1176_s0, %s572_s18  ;;  %s228_s14 = scalar_lea.sflag [#allocation3], %s227_s6 }
  0x2a   : > { %s239_s28 = sshll.u32 %s237_s12, 4  ;;  %250 = sbr.rel (%p1008_p3) target bundleno = 315 (0x13b), region = 32  ;;  %s240_s28 = int_to_ptr.hbm [resolvable:$true] %s239_s28 }
  0x2b   : > { %615 = dma.hbm_to_vmem [thread:$0]  (!%p613_p7), %s240_s28, 128, %s242_s11, %s228_s14  }
  0x2c   : > { %s1070_s13 = sand.u32 (!%p1008_p3), 1, %s898_s19  }
  0x2d   : > { %s574_s1 = sshll.u32 (!%p1008_p3), %s1070_s13, 3  ;;  %s253_s10 = scalar_lea.sflag (!%p1008_p3), [#allocation3], %s1070_s13 }
  0x2e   : > { %s256_s27 = scalar_lea.vmem (!%p1008_p3), [#allocation2], %s574_s1 }
  0x2f   : > { %877 = dma.done.wait (%p1041_p0), %s253_s10, 128  }
  0x30   : > { %879 = vsyncadd (%p1041_p0), %s253_s10, 4294967168 }
  0x31   : > { %881 = dma.done.wait (%p61_p1), [#allocation6], 128  }
  0x32   : > { %883 = vsyncadd (%p61_p1), [#allocation6], 4294967168  ;;  %v595_v0 = vld [vmem:[#allocation5] sm:$0xff]  ;;  %v300_v1 = vld [vmem:[%s256_s27] sm:$0xff]  ;;  %vm314_vm0 = vcmask 130048   ;;  %s587_s4 = sshll.u32 %s910_s22, 1 }
  0x33   : > { %v301_v2 = vpack.c.bf16 %v300_v1, %v300_v1  ;;  %325 = vmatpush.bf16.msra.mxu0 %v595_v0  ;;  %s364_s5 = sadd.s32 %s906_s21, %s587_s4  ;;  %v699_v3 = vld [vmem:[%s1178_s2] ss:$0 sm:$0xff]  ;;  %s1088_s11 = sshll.u32 %s1070_s13, 2  ;;  %vm332_vm1 = vcmask 257024  }
  0x34   : > { %s1090_s12 = sshll.u32 %s364_s5, 2  ;;  %s284_s21 = scalar_lea.vmem [#allocation7], %s1088_s11 }
  0x35   : > { %s366_s28 = scalar_lea.hbm %s1179_s3, %s1090_s12  ;;  %s368_s22 = sshll.u32 %s284_s21, 4  ;;  %s369_s22 = int_to_ptr.vmem [resolvable:$true] %s368_s22 }
  0x36   : > { %583 = vmatmul.msk.bf16.vlgmr.msra.gmra.mxu0 %vm314_vm0, %v301_v2  ;;  %s370_s29 = sshll.u32 %s366_s28, 4  ;;  %s927_s6 = smov 96   ;;  %s371_s29 = int_to_ptr.hbm [resolvable:$true] %s370_s29 }
  0x37   : > { %s344_s7 = scalar_lea.sflag [#allocation4], %s1070_s13  ;;  %s774_s9 = sshra.s32 %s371_s29, 4  ;;  %s775_s9 = int_to_ptr.hbm [resolvable:$true] %s774_s9 }
  0x38   : > { %s776_s14 = scalar_lea.hbm %s775_s9, 4  ;;  %s780_s27 = scalar_lea.hbm %s1179_s3, 16 }
  0x39   : > { %p777_p1 = scmp.ne.s32.totalorder %s775_s9, %s776_s14  ;;  %p781_p9 = scmp.lt.s32.totalorder %s775_s9, %s1179_s3 }
  0x3a   : > { %p782_p10 = scmp.lt.s32.totalorder %s780_s27, %s776_s14 }
  0x3b   : > { %p778_p3 = pnand %p777_p1, %p1045_p2 }
  0x3c   : > { %p783_p11 = por %p782_p10, %p781_p9 }
  0x3d   : > { %p779_p8 = pneg %p778_p3 }
  0x3f   : > { %p784_p12 = pnand %p783_p11, %p779_p8 }
  0xb3   : > { %v327_v4 = vpop.f32.mrf.mxu0 }
  0xb4   : > { %v328_v5 = vadd.f32 %v699_v3, %v327_v4 }
  0xb6   : > { %v331_v6 = vpack.c.bf16 %v328_v5, %v328_v5 }
  0xb8   : > { %335 = vrot.lane.b32.xlu0 %v331_v6, %s927_s6  ;;  %333 = vst.msk [vmem:[%s284_s21] sm:$0xf] %vm332_vm1, %v331_v6 }
  0xb9   : > { %787 = shalt.err (!%p784_p12)
}
  0xba   : > { %602 = dma.vmem_to_hbm [thread:$0]  (%p1045_p2), %s369_s22, 64, %s371_s29, %s344_s7  }
  0xbb   : > { %v329_v7 = vpop.f32.mrf.mxu0  ;;  %s928_s13 = smov 64   ;;  %s1202_s15 = sld [smem:[#allocation20_spill]] }
  0xbc   : > { %s348_s28 = sand.u32 1, %s1000_s26   ;;  %s291_s21 = scalar_lea.vmem [#allocation8], %s1088_s11 }
  0xbd   : > { %s384_s6 = sshll.u32 %s291_s21, 4  ;;  %s1203_s22 = sld [smem:[#allocation21_spill]]  ;;  %s385_s6 = int_to_ptr.vmem [resolvable:$true] %s384_s6 }
  0xbe   : > { %s1120_s10 = scalar_lea.sflag [#allocation9], %s348_s28 }
  0xc0   : > { %339 = vrot.lane.b32.xlu0 %v331_v6, %s928_s13 }
  0xc1   : > { %s382_s16 = scalar_lea.hbm %s1202_s15, %s1090_s12  ;;  %s808_s13 = scalar_lea.hbm %s1202_s15, 16 }
  0xc2   : > { %s386_s9 = sshll.u32 %s382_s16, 4  ;;  %s387_s9 = int_to_ptr.hbm [resolvable:$true] %s386_s9 }
  0xc3   : > { %s1204_s29 = smov %s1203_s22  ;;  %s398_s7 = scalar_lea.hbm %s1203_s22, %s1090_s12 }
  0xc4   : > { %s802_s27 = sshra.s32 %s387_s9, 4  ;;  %s803_s27 = int_to_ptr.hbm [resolvable:$true] %s802_s27 }
  0xc5   : > { %s804_s4 = scalar_lea.hbm %s803_s27, 4  ;;  %p809_p6 = scmp.lt.s32.totalorder %s803_s27, %s1202_s15 }
  0xc6   : > { %p805_p13 = scmp.ne.s32.totalorder %s803_s27, %s804_s4  ;;  %p810_p7 = scmp.lt.s32.totalorder %s808_s13, %s804_s4 }
  0xc8   : > { %p806_p0 = pnand %p805_p13, %p1045_p2  ;;  %p811_p1 = por %p810_p7, %p809_p6 }
  0xca   : > { %p807_p5 = pneg %p806_p0 }
  0xcc   : > { %p812_p3 = pnand %p811_p1, %p807_p5 }
 0x12a   : > { %v336_v8 = vpop.permute.xlu0 %335 }
 0x12b   : > { %338 = vst.msk [vmem:[%s291_s21] sm:$0xf] %vm332_vm1, %v336_v8 }
 0x12c   : > { %815 = shalt.err (!%p812_p3)
}
 0x12d   : > { %603 = dma.vmem_to_hbm [thread:$0]  (%p1045_p2), %s385_s6, 64, %s387_s9, %s1120_s10  }
 0x12e   : > { %s298_s12 = scalar_lea.vmem [#allocation10], %s1088_s11  ;;  %s402_s28 = sshll.u32 %s398_s7, 4  ;;  %s403_s28 = int_to_ptr.hbm [resolvable:$true] %s402_s28 }
 0x12f   : > { %s400_s16 = sshll.u32 %s298_s12, 4  ;;  %s830_s21 = sshra.s32 %s403_s28, 4  ;;  %s401_s16 = int_to_ptr.vmem [resolvable:$true] %s400_s16  ;;  %s831_s21 = int_to_ptr.hbm [resolvable:$true] %s830_s21 }
 0x130   : > { %s832_s14 = scalar_lea.hbm %s831_s21, 4  ;;  %s836_s27 = scalar_lea.hbm %s1204_s29, 16 }
 0x131   : > { %p833_p8 = scmp.ne.s32.totalorder %s831_s21, %s832_s14  ;;  %p837_p11 = scmp.lt.s32.totalorder %s831_s21, %s1204_s29 }
 0x132   : > { %v340_v9 = vpop.permute.xlu0 %339  ;;  %p838_p12 = scmp.lt.s32.totalorder %s836_s27, %s832_s14 }
 0x133   : > { %342 = vst.msk [vmem:[%s298_s12] sm:$0xf] %vm332_vm1, %v340_v9  ;;  %p834_p9 = pnand %p833_p8, %p1045_p2 }
 0x134   : > { %p839_p13 = por %p838_p12, %p837_p11 }
 0x135   : > { %p835_p10 = pneg %p834_p9 }
 0x137   : > { %p840_p0 = pnand %p839_p13, %p835_p10 }
 0x139   : > { %843 = shalt.err (!%p840_p0)
}
 0x13a   : > { %604 = dma.vmem_to_hbm [thread:$0]  (%p1045_p2), %s401_s16, 64, %s403_s28, %s1120_s10  }
 0x13b PF: > { %s1205_s9 = sld [smem:[#allocation15_spill]]  ;;  %p629_p5 = scmp.ge.s32.totalorder %s922_s25, 2 }
 0x13d   : > { %p617_p6 = pnand %p629_p5, %p1051_p4 }
 0x13f   : > { %p618_p7 = pneg %p617_p6 }
 0x141   : > { %s414_s4 = sand.u32 1, %s1205_s9  }
 0x142   : > { %s415_s26 = scalar_lea.sflag [#allocation4], %s414_s4 }
 0x143   : > { %885 = dma.done.wait (%p618_p7), %s415_s26, 64  }
 0x144   : > { %887 = vsyncadd (%p618_p7), %s415_s26, 4294967232  ;;  %s1207_s5 = sadd.s32 4294967294, %s922_s25  }
 0x145   : > { %s424_s13 = sand.u32 1, %s1207_s5  }
 0x146   : > { %s425_s18 = scalar_lea.sflag [#allocation9], %s424_s13 }
 0x147   : > { %889 = dma.done.wait (%p618_p7), %s425_s18, 128  }
 0x148   : > { %891 = vsyncadd (%p618_p7), %s425_s18, 4294967168  ;;  %s26_s25 = sadd.s32 1, %s922_s25   ;;  %s1208_s17 = sld [smem:[#allocation16_spill]] }
 0x149   : > { %p23_p2 = scmp.ge.s32.totalorder %s26_s25, 6   ;;  %s1209_s10 = sld [smem:[#allocation17_spill]] }
 0x14a   : > { %s1210_s18 = smov %s898_s19  ;;  %s1211_s19 = smov %s902_s20 }
 0x14b   : > { %s1212_s20 = smov %s1058_s8  ;;  %s1213_s21 = smov %s914_s23 }
 0x14c   : > { %s1214_s22 = smov %s918_s24  ;;  %25 = sbr.rel (!%p23_p2) target bundleno = 14 (0xe), region = 113 }
 0x14e   : > { %s1215_s23 = smov %s1208_s17 }
 0x14f   : > { %s1216_s24 = smov %s1209_s10 }
 0x151   :  { %441 = vsyncpa [#allocation3], 1 }
 0x152   :  { %443 = vsyncpa [#allocation3 + $0x1], 1 }
 0x153   :  { %444 = vsyncpa [#allocation6], 1 }
 0x154   :  { %445 = vsyncpa [#allocation4], 1 }
 0x155   :  { %447 = vsyncpa [#allocation4 + $0x1], 1 }
 0x156   :  { %448 = vsyncpa [#allocation9], 1 }
 0x157   :  { %450 = vsyncpa [#allocation9 + $0x1], 1 }

</bundles_post_ra>
